<compile_context>
chip_gen: v7x
topology: tpu7x:2x2x1
jax: 0.10.0
libtpu: 0.0.40
codegen_flags: <defaults>
</compile_context>

<pallas_src>
import jax
import jax.numpy as jnp
from jax.experimental import pallas as pl
from jax.experimental.pallas import tpu as pltpu


def _round_up(x, m):
    return ((x + m - 1) // m) * m


def _pos_enc_kernel(x_ref, w_ref, posb_ref, o_ref):
    # x_ref   : (bb, bn, patch_len)
    # w_ref   : (patch_len, d_model_p)
    # posb_ref: (bn, d_model_p) f32   == W_pos + bias (zero-padded)
    # o_ref   : (bb, bn, d_model_p)
    bb, bn, plen = x_ref.shape
    dmp = o_ref.shape[-1]
    # Single 2D MXU matmul over all (batch, patch) rows in the block. The
    # (bb, bn, plen) -> (bb*bn, plen) leading-dim collapse is layout-free when
    # bn is sublane-aligned (the wrapper picks bn that way when tiling).
    x2 = x_ref[...].reshape(bb * bn, plen)
    y = jnp.dot(x2, w_ref[...], preferred_element_type=jnp.float32)
    y = y.reshape(bb, bn, dmp) + posb_ref[...][None, :, :]
    o_ref[...] = y.astype(o_ref.dtype)


def _vmem_budget_bytes():
    """Physical VMEM for this generation (fallback 64 MiB, the v7x budget)."""
    try:
        return int(pltpu.get_tpu_info().vmem_capacity_bytes)
    except Exception:
        return 64 << 20


def _choose_blocks(B, patch_num, patch_len, d_model_p, itemsize, sublane):
    """Pick (bb, bn): batch rows / patch rows per grid step.

    The per-step (x + out) block data targets ~VMEM/8 (=> ~VMEM/4 once double
    buffered): ~16 MiB/step on v5e/v6e (128 MiB VMEM), ~8 MiB/step on v7x
    (64 MiB VMEM).  That keeps the ~0.35us per-step overhead well under 10% of
    the HBM-roofline step time on all generations while leaving plenty of
    headroom for the constant operands and compiler scratch.
    """
    vmem = _vmem_budget_bytes()
    target = max(2 << 20, vmem // 8)

    lane_plen = _round_up(patch_len, 128)  # x's lane dim is padded to 128 in VMEM

    def step_bytes(bb, bn):
        bn_pad = _round_up(bn, sublane)
        return bb * bn_pad * (lane_plen + d_model_p) * itemsize

    # Full patch axis per step unless even a single batch row would blow the
    # per-step byte budget; in that case tile patch_num in sublane-aligned
    # chunks (block-shape (8,128) rule requires bn % 8 == 0 when bn < patch_num).
    bn = patch_num
    if step_bytes(1, patch_num) > target:
        bn = max(sublane, (target // max(1, step_bytes(1, sublane))) * sublane)
        bn = min(bn, _round_up(patch_num, sublane))

    # Largest batch block meeting the byte target.
    bb = int(max(1, min(B, target // max(1, step_bytes(1, bn)))))

    # Prefer >=2 grid steps (pipelining) ...
    while bb > 1 and pl.cdiv(B, bb) * pl.cdiv(patch_num, bn) < 2:
        bb -= 1
    # ... and an even total step count so v7x's two TensorCores stay balanced.
    nb_b, nb_n = pl.cdiv(B, bb), pl.cdiv(patch_num, bn)
    if nb_b > 1 and (nb_b % 2 == 1) and (nb_n % 2 == 1):
        bb = max(1, pl.cdiv(B, nb_b + 1))
    return bb, bn


def positional_encoding(x, w_p, b_p, w_pos, block_b=None, block_n=None):
    """x: [B, patch_num, patch_len]; w_p: [patch_len, d_model];
    b_p: [d_model]; w_pos: [patch_num, d_model]. Returns [B, patch_num, d_model].
    Inputs may be f32 or bf16 (accumulation is f32 either way)."""
    B, patch_num, patch_len = x.shape
    d_model = w_p.shape[1]
    assert w_p.shape == (patch_len, d_model)
    assert w_pos.shape == (patch_num, d_model)

    dtype = x.dtype
    itemsize = jnp.dtype(dtype).itemsize
    sublane = 16 if itemsize == 2 else 8  # bf16 sublane packing

    # Fold the Linear bias into the positional table (kept f32 for the add):
    #   (x @ W + b) + W_pos == x @ W + (W_pos + b)
    pos_b = (w_pos.astype(jnp.float32) + b_p.astype(jnp.float32)[None, :])

    # Lane-dense output: pad d_model up to a multiple of 128 (unmasked vst).
    # No-op for d_model in {128, 256, ...}.
    # TODO(synk): when d_model is not a 128-multiple and the consumer can take
    # the padded slab, skip the epilogue slice below to save one HBM pass.
    d_model_p = _round_up(d_model, 128)
    if d_model_p != d_model:
        w_p_k = jnp.pad(w_p, ((0, 0), (0, d_model_p - d_model)))
        pos_b_k = jnp.pad(pos_b, ((0, 0), (0, d_model_p - d_model)))
    else:
        w_p_k, pos_b_k = w_p, pos_b

    bb, bn = _choose_blocks(B, patch_num, patch_len, d_model_p, itemsize, sublane)
    if block_b is not None:
        bb = block_b
    if block_n is not None:
        bn = block_n

    nb_b = pl.cdiv(B, bb)
    nb_n = pl.cdiv(patch_num, bn)
    B_pad = nb_b * bb
    N_pad = nb_n * bn

    # Pad one partial block instead of shrinking the block size.
    x_k = x
    if B_pad != B or N_pad != patch_num:
        x_k = jnp.pad(x, ((0, B_pad - B), (0, N_pad - patch_num), (0, 0)))
    if N_pad != patch_num:
        pos_b_k = jnp.pad(pos_b_k, ((0, N_pad - patch_num), (0, 0)))

    # VMEM accounting: double-buffered (x+out) blocks + constant operands + headroom.
    lane_plen = _round_up(patch_len, 128)
    xo_step = bb * _round_up(bn, sublane) * (lane_plen + d_model_p) * itemsize
    const_bytes = (_round_up(patch_len, 8) * d_model_p * itemsize
                   + _round_up(bn, 8) * d_model_p * 4)
    vmem = _vmem_budget_bytes()
    vmem_limit = min(int(vmem * 0.75), 2 * xo_step + 2 * const_bytes + (8 << 20))
    vmem_limit = max(vmem_limit, 16 << 20)

    x_spec = pl.BlockSpec((bb, bn, patch_len), lambda b, n: (b, n, 0))
    o_spec = pl.BlockSpec((bb, bn, d_model_p), lambda b, n: (b, n, 0))

    def const_specs(single_buffer):
        kw = {}
        if single_buffer and hasattr(pl, "Buffered"):
            kw = dict(pipeline_mode=pl.Buffered(1))  # constant operands: one buffer
        return [pl.BlockSpec((patch_len, d_model_p), lambda b, n: (0, 0), **kw),
                pl.BlockSpec((bn, d_model_p), lambda b, n: (n, 0), **kw)]

    def build(single_buffer):
        return pl.pallas_call(
            _pos_enc_kernel,
            out_shape=jax.ShapeDtypeStruct((B_pad, N_pad, d_model_p), dtype),
            grid_spec=pltpu.PrefetchScalarGridSpec(
                num_scalar_prefetch=0,
                grid=(nb_b, nb_n),
                in_specs=[x_spec] + const_specs(single_buffer),
                out_specs=o_spec,
            ),
            compiler_params=pltpu.CompilerParams(
                dimension_semantics=("parallel", "parallel"),
                vmem_limit_bytes=int(vmem_limit),
            ),
        )

    try:
        out = build(single_buffer=True)(x_k, w_p_k, pos_b_k)
    except Exception:
        # Fallback: default double-buffered constants (e.g. if pl.Buffered(1)
        # is rejected by this jax/Mosaic version).
        out = build(single_buffer=False)(x_k, w_p_k, pos_b_k)

    if (B_pad, N_pad, d_model_p) != (B, patch_num, d_model):
        out = out[:B, :patch_num, :d_model]
    return out


def reference(x, w_p, b_p, w_pos):
    return jnp.einsum("bnp,pd->bnd", x, w_p) + b_p[None, None, :] + w_pos[None, :, :]


def _make_params(key, patch_len, patch_num, d_model):
    k_w, k_b, k_pos = jax.random.split(key, 3)
    bound = 1.0 / (patch_len ** 0.5)
    # W_P: nn.Linear(patch_len, d_model) -> weight (d_model, patch_len), bias (d_model,)
    w_linear = jax.random.uniform(k_w, (d_model, patch_len), jnp.float32,
                                  minval=-bound, maxval=bound)
    b_linear = jax.random.uniform(k_b, (d_model,), jnp.float32,
                                  minval=-bound, maxval=bound)
    # W_pos: (patch_num, d_model), uniform(-0.02, 0.02)
    w_pos = jax.random.uniform(k_pos, (patch_num, d_model), jnp.float32,
                               minval=-0.02, maxval=0.02)
    return w_linear.T, b_linear, w_pos  # kernel consumes (patch_len, d_model)


if __name__ == "__main__":
    key = jax.random.PRNGKey(0)
    k1, k2, k3, k4 = jax.random.split(key, 4)

    # Case 1: small module-consistent shapes (exercises d_model<128 pad+slice path).
    B, patch_num, patch_len, d_model = 2, 8, 16, 32
    w_p, b_p, w_pos = _make_params(k1, patch_len, patch_num, d_model)
    x = jax.random.normal(k2, (B, patch_num, patch_len), jnp.float32)
    out = jax.block_until_ready(positional_encoding(x, w_p, b_p, w_pos))
    ref = reference(x, w_p, b_p, w_pos)
    assert out.shape == (B, patch_num, d_model)
    assert jnp.allclose(out, ref, atol=1e-5, rtol=1e-5), "mismatch vs reference (case 1)"

    # Case 2: non-divisible batch + lane-aligned d_model (exercises batch padding path).
    B2, patch_num2, patch_len2, d_model2 = 5, 8, 16, 128
    w_p2, b_p2, w_pos2 = _make_params(k3, patch_len2, patch_num2, d_model2)
    x2 = jax.random.normal(k4, (B2, patch_num2, patch_len2), jnp.float32)
    out2 = jax.block_until_ready(positional_encoding(x2, w_p2, b_p2, w_pos2))
    ref2 = reference(x2, w_p2, b_p2, w_pos2)
    assert out2.shape == (B2, patch_num2, d_model2)
    assert jnp.allclose(out2, ref2, atol=1e-5, rtol=1e-5), "mismatch vs reference (case 2)"

    print("KERNEL_OK")
</pallas_src>

<mosaic_0001>
module attributes {stable_mosaic.version = 11 : i64} {
  func.func @_pos_enc_kernel(%arg0: i32, %arg1: i32, %arg2: memref<1x8x16xf32, #tpu.memory_space<vmem>>, %arg3: memref<16x128xf32, #tpu.memory_space<vmem>>, %arg4: memref<8x128xf32, #tpu.memory_space<vmem>>, %arg5: memref<1x8x128xf32, #tpu.memory_space<vmem>>) attributes {dimension_semantics = [#tpu.dimension_semantics<parallel>, #tpu.dimension_semantics<parallel>], iteration_bounds = array<i64: 2, 1>, scalar_prefetch = 0 : i64, scratch_operands = 0 : i64, tpu.core_type = #tpu.core_type<tc>, window_params = [{transform_indices = @transform_0, window_bounds = array<i64: 1, 8, 16>}, {pipeline_mode = #tpu.pipeline_mode<synchronous>, transform_indices = @transform_1, window_bounds = array<i64: 16, 128>}, {pipeline_mode = #tpu.pipeline_mode<synchronous>, transform_indices = @transform_2, window_bounds = array<i64: 8, 128>}, {transform_indices = @transform_3, window_bounds = array<i64: 1, 8, 128>}]} {
    %c0 = arith.constant 0 : index
    %c0_0 = arith.constant 0 : index
    %c0_1 = arith.constant 0 : index
    %0 = vector.load %arg2[%c0, %c0_0, %c0_1] : memref<1x8x16xf32, #tpu.memory_space<vmem>>, vector<1x8x16xf32>
    %1 = vector.shape_cast %0 : vector<1x8x16xf32> to vector<8x16xf32>
    %c0_2 = arith.constant 0 : index
    %c0_3 = arith.constant 0 : index
    %2 = vector.load %arg3[%c0_2, %c0_3] : memref<16x128xf32, #tpu.memory_space<vmem>>, vector<16x128xf32>
    %cst = arith.constant dense<0.000000e+00> : vector<8x128xf32>
    %3 = tpu.matmul %1, %2, %cst {dimension_numbers = #tpu.dot_dimension_numbers<[1], [0], [0], [1], [0, 0, 1, 1], [], []>} : vector<8x16xf32>, vector<16x128xf32>, vector<8x128xf32> -> vector<8x128xf32>
    %4 = vector.shape_cast %3 : vector<8x128xf32> to vector<1x8x128xf32>
    %c0_4 = arith.constant 0 : index
    %c0_5 = arith.constant 0 : index
    %5 = vector.load %arg4[%c0_4, %c0_5] : memref<8x128xf32, #tpu.memory_space<vmem>>, vector<8x128xf32>
    %6 = vector.shape_cast %5 : vector<8x128xf32> to vector<1x8x128xf32>
    %7 = arith.addf %4, %6 : vector<1x8x128xf32>
    %c0_6 = arith.constant 0 : index
    %c0_7 = arith.constant 0 : index
    %c0_8 = arith.constant 0 : index
    %8 = vector.load %arg5[%c0_6, %c0_7, %c0_8] : memref<1x8x128xf32, #tpu.memory_space<vmem>>, vector<1x8x128xf32>
    tpu.vector_store %arg5[%c0_6, %c0_7, %c0_8], %7 {strides = array<i32>} : memref<1x8x128xf32, #tpu.memory_space<vmem>>, vector<1x8x128xf32>,
    return
  }
  func.func @transform_0(%arg0: i32, %arg1: i32) -> (i32, i32, i32) {
    %c0_i32 = arith.constant 0 : i32
    %c0_i32_0 = arith.constant 0 : i32
    return %arg0, %arg1, %c0_i32 : i32, i32, i32
  }
  func.func @transform_1(%arg0: i32, %arg1: i32) -> (i32, i32) {
    %c0_i32 = arith.constant 0 : i32
    %c0_i32_0 = arith.constant 0 : i32
    %c0_i32_1 = arith.constant 0 : i32
    return %c0_i32, %c0_i32_0 : i32, i32
  }
  func.func @transform_2(%arg0: i32, %arg1: i32) -> (i32, i32) {
    %c0_i32 = arith.constant 0 : i32
    %c0_i32_0 = arith.constant 0 : i32
    return %arg1, %c0_i32 : i32, i32
  }
  func.func @transform_3(%arg0: i32, %arg1: i32) -> (i32, i32, i32) {
    %c0_i32 = arith.constant 0 : i32
    %c0_i32_0 = arith.constant 0 : i32
    return %arg0, %arg1, %c0_i32 : i32, i32, i32
  }
}

module attributes {stable_mosaic.version = 11 : i64} {
  func.func @_pos_enc_kernel(%arg0: i32, %arg1: i32, %arg2: memref<1x8x16xf32, #tpu.memory_space<vmem>>, %arg3: memref<16x128xf32, #tpu.memory_space<vmem>>, %arg4: memref<8x128xf32, #tpu.memory_space<vmem>>, %arg5: memref<1x8x128xf32, #tpu.memory_space<vmem>>) attributes {dimension_semantics = [#tpu.dimension_semantics<parallel>, #tpu.dimension_semantics<parallel>], iteration_bounds = array<i64: 2, 1>, scalar_prefetch = 0 : i64, scratch_operands = 0 : i64, tpu.core_type = #tpu.core_type<tc>, window_params = [{transform_indices = @transform_0, window_bounds = array<i64: 1, 8, 16>}, {pipeline_mode = #tpu.pipeline_mode<synchronous>, transform_indices = @transform_1, window_bounds = array<i64: 16, 128>}, {transform_indices = @transform_2, window_bounds = array<i64: 8, 128>}, {transform_indices = @transform_3, window_bounds = array<i64: 1, 8, 128>}]} {
    %c0 = arith.constant 0 : index
    %c0_0 = arith.constant 0 : index
    %c0_1 = arith.constant 0 : index
    %0 = vector.load %arg2[%c0, %c0_0, %c0_1] : memref<1x8x16xf32, #tpu.memory_space<vmem>>, vector<1x8x16xf32>
    %1 = vector.shape_cast %0 : vector<1x8x16xf32> to vector<8x16xf32>
    %c0_2 = arith.constant 0 : index
    %c0_3 = arith.constant 0 : index
    %2 = vector.load %arg3[%c0_2, %c0_3] : memref<16x128xf32, #tpu.memory_space<vmem>>, vector<16x128xf32>
    %cst = arith.constant dense<0.000000e+00> : vector<8x128xf32>
    %3 = tpu.matmul %1, %2, %cst {dimension_numbers = #tpu.dot_dimension_numbers<[1], [0], [0], [1], [0, 0, 1, 1], [], []>} : vector<8x16xf32>, vector<16x128xf32>, vector<8x128xf32> -> vector<8x128xf32>
    %4 = vector.shape_cast %3 : vector<8x128xf32> to vector<1x8x128xf32>
    %c0_4 = arith.constant 0 : index
    %c0_5 = arith.constant 0 : index
    %5 = vector.load %arg4[%c0_4, %c0_5] : memref<8x128xf32, #tpu.memory_space<vmem>>, vector<8x128xf32>
    %6 = vector.shape_cast %5 : vector<8x128xf32> to vector<1x8x128xf32>
    %7 = arith.addf %4, %6 : vector<1x8x128xf32>
    %c0_6 = arith.constant 0 : index
    %c0_7 = arith.constant 0 : index
    %c0_8 = arith.constant 0 : index
    %8 = vector.load %arg5[%c0_6, %c0_7, %c0_8] : memref<1x8x128xf32, #tpu.memory_space<vmem>>, vector<1x8x128xf32>
    tpu.vector_store %arg5[%c0_6, %c0_7, %c0_8], %7 {strides = array<i32>} : memref<1x8x128xf32, #tpu.memory_space<vmem>>, vector<1x8x128xf32>,
    return
  }
  func.func @transform_0(%arg0: i32, %arg1: i32) -> (i32, i32, i32) {
    %c0_i32 = arith.constant 0 : i32
    %c0_i32_0 = arith.constant 0 : i32
    return %arg0, %arg1, %c0_i32 : i32, i32, i32
  }
  func.func @transform_1(%arg0: i32, %arg1: i32) -> (i32, i32) {
    %c0_i32 = arith.constant 0 : i32
    %c0_i32_0 = arith.constant 0 : i32
    %c0_i32_1 = arith.constant 0 : i32
    return %c0_i32, %c0_i32_0 : i32, i32
  }
  func.func @transform_2(%arg0: i32, %arg1: i32) -> (i32, i32) {
    %c0_i32 = arith.constant 0 : i32
    %c0_i32_0 = arith.constant 0 : i32
    return %arg1, %c0_i32 : i32, i32
  }
  func.func @transform_3(%arg0: i32, %arg1: i32) -> (i32, i32, i32) {
    %c0_i32 = arith.constant 0 : i32
    %c0_i32_0 = arith.constant 0 : i32
    return %arg0, %arg1, %c0_i32 : i32, i32, i32
  }
}

</mosaic_0001>

<bundles_post_ra>
// kernel: tpu_custom_call.1
= control target key start
LH: loop header
LB: loop body
LE: loop exit
PB: predicated region body
PF: predicated region fallthrough
CT: control target
= control target key end

     0   :  { %8 = vsyncpa [#allocation3], 0  ;;  %s1005_s0 = inlined_call_operand.hbm [shape: f32[2,8,16], index: 0, kind: input, shape index: {}]   ;;  %s1006_s1 = inlined_call_operand.hbm [shape: f32[16,128], index: 1, kind: input, shape index: {}]   ;;  %s1007_s2 = inlined_call_operand.hbm [shape: f32[8,128], index: 2, kind: input, shape index: {}]   ;;  %s1008_s3 = inlined_call_operand.hbm [shape: f32[2,8,128], index: 3, kind: output, shape index: {}]  }
   0x1   :  { %10 = vsyncpa [#allocation3 + $0x1], 0 }
   0x2   :  { %11 = vsyncpa [#allocation6], 0 }
   0x3   :  { %12 = vsyncpa [#allocation4], 0 }
   0x4   :  { %14 = vsyncpa [#allocation4 + $0x1], 0  ;;  %s755_s12 = smov 0   ;;  %s757_s13 = smov 0  }
   0x5   :  { %s759_s14 = smov 0   ;;  %s761_s15 = smov 0  }
   0x6   :  { %s763_s16 = smov 0   ;;  %s765_s17 = smov 0  }
   0x7 LB: > { %s433_s18 = sadd.s32 4294967295, %s724_s17   ;;  %s434_s19 = sadd.s32 4294967294, %s724_s17   ;;  %s724_s17 = sphi %s765_s17, %s20_s17   ;;  %s720_s16 = sphi %s763_s16, %s1030_s16   ;;  %s716_s15 = sphi %s761_s15, %s1029_s15   ;;  %s712_s14 = sphi %s759_s14, %s1028_s14   ;;  %s708_s13 = sphi %s757_s13, %s1027_s13   ;;  %s704_s12 = sphi %s755_s12, %s1026_s12  }
   0x8   : > { %p54_p0 = scmp.ne.s32.totalorder %s708_s13, %s704_s12  ;;  %p789_p1 = scmp.eq.s32.totalorder %s433_s18, 0 }
   0x9   : > { %p793_p2 = scmp.eq.s32.totalorder %s433_s18, 1  ;;  %p133_p3 = scmp.eq.s32.totalorder %s434_s19, 1 }
   0xa   : > { %s1013_s20 = scalar_select %p789_p1, 1, 0 }
   0xb   : > { %p799_p4 = por %p789_p1, %p54_p0  ;;  %p435_p5 = scmp.ge.s32.totalorder %s724_s17, 1 }
   0xc   : > { %p804_p6 = por %p133_p3, %p54_p0  ;;  %p140_p7 = scmp.lt.s32.totalorder %s724_s17, 3 }
   0xd   : > { %s1015_s22 = scalar_select %p799_p4, 1, 0 }
   0xe   : > { %s1016_s23 = scalar_select %p804_p6, 1, 0 }
   0xf   : > { %p809_p8 = pnand %p435_p5, %p140_p7  ;;  %s726_s25 = smov [#allocation5]  }
  0x10   : > { %s152_s26 = sshll.u32 %s726_s25, 4  ;;  %s727_s28 = smov [#allocation7]   ;;  %s813_s26 = int_to_ptr.vmem [resolvable:$true] %s152_s26 }
  0x11   : > { %p476_p9 = pneg %p809_p8  ;;  %s168_s29 = sshll.u32 %s727_s28, 4  ;;  %s824_s29 = int_to_ptr.vmem [resolvable:$true] %s168_s29 }
  0x12   : > { %s552_s5 = scalar_lea.hbm %s1006_s1, 256 }
  0x13   : > { %p820_p11 = pnand %p476_p9, %p789_p1  ;;  %p553_p12 = scmp.ne.s32.totalorder %s1006_s1, %s552_s5 }
  0x14   : > { %p559_p5 = scmp.lt.u32.totalorder %s552_s5, %s1006_s1 }
  0x15   : > { %p554_p13 = pneg %p820_p11 }
  0x17   : > { %p555_p0 = pnand %p554_p13, %p553_p12 }
  0x19   : > { %p556_p3 = pneg %p555_p0 }
  0x1b   : > { %p561_p7 = pnand %p559_p5, %p556_p3 }
  0x1d   : > { %564 = shalt.err (!%p561_p7)
}
  0x1e   : > { %s565_s10 = scalar_lea.vmem %s813_s26, 256  ;;  %p573_p1 = scmp.lt.s32.totalorder %s813_s26, %s813_s26 }
  0x1f   : > { %p566_p9 = scmp.ne.s32.totalorder %s813_s26, %s565_s10  ;;  %p574_p12 = scmp.lt.s32.totalorder %s565_s10, %s565_s10 }
  0x21   : > { %p568_p10 = pnand %p566_p9, %p554_p13  ;;  %p575_p0 = por %p574_p12, %p573_p1 }
  0x23   : > { %p569_p6 = pneg %p568_p10 }
  0x25   : > { %p576_p4 = pnand %p575_p0, %p569_p6 }
  0x27   : > { %579 = shalt.err (!%p576_p4)
}
  0x28   : > { %s728_s11 = smov 128   ;;  %s729_s18 = smov 8  }
  0x29   : > { %479 = dma.hbm_to_vmem [thread:$0]  (!%p820_p11), %s1006_s1, 256, %s813_s26, [#allocation6], %s728_s11, %s728_s11, %s729_s18  }
  0x2a   : > { %s580_s4 = scalar_lea.hbm %s1007_s2, 128 }
  0x2b   : > { %p581_p1 = scmp.ne.s32.totalorder %s1007_s2, %s580_s4  ;;  %p587_p10 = scmp.lt.u32.totalorder %s580_s4, %s1007_s2 }
  0x2d   : > { %p583_p4 = pnand %p581_p1, %p554_p13 }
  0x2f   : > { %p584_p6 = pneg %p583_p4 }
  0x31   : > { %p589_p3 = pnand %p587_p10, %p584_p6 }
  0x33   : > { %592 = shalt.err (!%p589_p3)
}
  0x34   : > { %s593_s26 = scalar_lea.vmem %s824_s29, 128  ;;  %p601_p12 = scmp.lt.s32.totalorder %s824_s29, %s824_s29 }
  0x35   : > { %p594_p5 = scmp.ne.s32.totalorder %s824_s29, %s593_s26  ;;  %p602_p0 = scmp.lt.s32.totalorder %s593_s26, %s593_s26 }
  0x37   : > { %p596_p7 = pnand %p594_p5, %p554_p13  ;;  %p603_p1 = por %p602_p0, %p601_p12 }
  0x39   : > { %p597_p9 = pneg %p596_p7 }
  0x3b   : > { %p604_p4 = pnand %p603_p1, %p597_p9 }
  0x3d   : > { %607 = shalt.err (!%p604_p4)
}
  0x3e   : > { %482 = dma.hbm_to_vmem [thread:$0]  (!%p820_p11), %s1007_s2, 128, %s824_s29, [#allocation6]  }
  0x3f   : > { %s32_s11 = sadd.s32 1, %s720_s16  ;;  %s41_s18 = sadd.s32 1, %s712_s14 }
  0x40   : > { %p34_p13 = scmp.ge.s32.totalorder %s32_s11, 2  ;;  %p48_p6 = scmp.ne.s32.totalorder %s712_s14, %s708_s13 }
  0x41   : > { %p49_p10 = scmp.eq.s32.totalorder %s724_s17, 0  ;;  %p493_p3 = scmp.lt.s32.totalorder %s724_s17, 2 }
  0x42   : > { %s1032_s11 = smov (%p34_p13, %s32_s11), 0  ;;  %p888_p7 = por %p793_p2, %p48_p6 }
  0x43   : > { %p50_p5 = por %p49_p10, %p48_p6  ;;  %s36_s19 = ssub.s32 %s720_s16, %s1032_s11 }
  0x44   : > { %s1019_s27 = scalar_select %p888_p7, 1, 0 }
  0x45   : > { %s179_s25 = sand.u32 1, %s712_s14   ;;  %p39_p9 = scmp.eq.s32.totalorder %s36_s19, 0 }
  0x46   : > { %s439_s29 = sshll.u32 %s179_s25, 3  ;;  %s440_s28 = sshll.u32 %s720_s16, 7 }
  0x47   : > { %s897_s30 = scalar_select %p39_p9, %s712_s14, %s41_s18  }
  0x48   : > { %s902_s6 = scalar_lea.hbm %s1005_s0, %s440_s28  ;;  %s183_s21 = scalar_lea.vmem [#allocation2], %s439_s29 }
  0x49   : > { %s191_s7 = sshll.u32 %s183_s21, 4  ;;  %p906_p2 = pnand %p493_p3, %p50_p5  ;;  %s910_s7 = int_to_ptr.vmem [resolvable:$true] %s191_s7 }
  0x4a   : > { %s180_s26 = scalar_lea.sflag [#allocation3], %s179_s25  ;;  %s608_s9 = scalar_lea.hbm %s902_s6, 128 }
  0x4b   : > { %p609_p11 = scmp.ne.s32.totalorder %s902_s6, %s608_s9  ;;  %p610_p12 = pneg %p906_p2 }
  0x4c   : > { %s613_s19 = scalar_lea.hbm %s1005_s0, 256  ;;  %p614_p4 = scmp.lt.u32.totalorder %s902_s6, %s1005_s0 }
  0x4d   : > { %p611_p0 = pnand %p610_p12, %p609_p11  ;;  %p615_p13 = scmp.lt.u32.totalorder %s613_s19, %s608_s9 }
  0x4e   : > { %p617_p10 = scmp.lt.u32.totalorder %s608_s9, %s902_s6 }
  0x4f   : > { %p612_p1 = pneg %p611_p0  ;;  %p616_p6 = por %p615_p13, %p614_p4 }
  0x51   : > { %p618_p3 = por %p617_p10, %p616_p6 }
  0x53   : > { %p619_p5 = pnand %p618_p3, %p612_p1 }
  0x55   : > { %622 = shalt.err (!%p619_p5)
}
  0x56   : > { %s623_s25 = scalar_lea.vmem %s910_s7, 128  ;;  %s730_s4 = smov [#allocation2]  }
  0x57   : > { %p624_p9 = scmp.ne.s32.totalorder %s910_s7, %s623_s25  ;;  %s628_s5 = sshll.u32 %s730_s4, 4  ;;  %s629_s5 = int_to_ptr.vmem [resolvable:$false] %s628_s5 }
  0x58   : > { %s630_s21 = scalar_lea.vmem %s629_s5, 256  ;;  %p631_p7 = scmp.lt.s32.totalorder %s910_s7, %s629_s5 }
  0x59   : > { %p626_p11 = pnand %p624_p9, %p610_p12  ;;  %p632_p4 = scmp.lt.s32.totalorder %s630_s21, %s623_s25 }
  0x5b   : > { %p627_p0 = pneg %p626_p11  ;;  %p633_p13 = por %p632_p4, %p631_p7 }
  0x5d   : > { %p634_p6 = pnand %p633_p13, %p627_p0 }
  0x5f   : > { %637 = shalt.err (!%p634_p6)
}
  0x60   : > { %486 = dma.hbm_to_vmem [thread:$0]  (!%p906_p2), %s902_s6, 128, %s910_s7, %s180_s26  }
  0x61   : > { %200 = sbr.rel (%p809_p8) target bundleno = 343 (0x157), region = 32  ;;  %s940_s9 = sand.u32 (!%p809_p8), 1, %s708_s13  }
  0x62   : > { %s442_s10 = sshll.u32 (!%p809_p8), %s940_s9, 3  ;;  %s203_s18 = scalar_lea.sflag (!%p809_p8), [#allocation3], %s940_s9 }
  0x63   : > { %s206_s19 = scalar_lea.vmem (!%p809_p8), [#allocation2], %s442_s10  ;;  %p1021_p7 = scmp.ne.s32.totalorder (!%p809_p8), %s1015_s22, 0 }
  0x68   : > { %691 = dma.done.wait (%p1021_p7), %s203_s18, 128  }
  0x69   : > { %693 = vsyncadd (%p1021_p7), %s203_s18, 4294967168  ;;  %p1022_p12 = scmp.ne.s32.totalorder %s1013_s20, 0 }
  0x6b   : > { %695 = dma.done.wait (%p1022_p12), [#allocation6], 384  }
  0x6c   : > { %697 = vsyncadd (%p1022_p12), [#allocation6], 4294966912  ;;  %v731_v0 = vmov 0.0|0.0   ;;  %vm732_vm0 = vmmov 0   ;;  %v733_v1 = vmov 0.0   ;;  %v238_v2 = vld [vmem:[#allocation5] sm:$0xff] }
  0x6d   : > { %461 = vmatprep.subr.bf16.mxu0 %v731_v0  ;;  %458 = vmatprep.mubr.msk.f32.mxu0 %vm732_vm0, %v733_v1  ;;  %v239_v3 = vld [vmem:[#allocation5 + $0x8] sm:$0xff]  ;;  %v237_v5 = vld [vmem:[%s206_s19] sm:$0xff]  ;;  %vm240_vm1 = vcmask 130048   ;;  %s448_s22 = sshll.u32 %s716_s15, 7  ;;  %s236_s24 = scalar_lea.vmem [#allocation8], %s442_s10 }
  0x6e   : > { %v462_v4 = vpack.c.bf16 %v239_v3, %v238_v2  ;;  %v314_v6 = vld [vmem:[#allocation7] sm:$0xff]  ;;  %s332_s20 = sshll.u32 %s236_s24, 4  ;;  %s956_s8 = scalar_lea.hbm %s1008_s3, %s448_s22  ;;  %s958_s20 = int_to_ptr.vmem [resolvable:$true] %s332_s20 }
  0x6f   : > { %s318_s26 = scalar_lea.sflag [#allocation4], %s940_s9  ;;  %s638_s29 = scalar_lea.vmem %s958_s20, 128 }
  0x70   : > { %463 = vmatpush3.bf16.msra.mxu0 %v462_v4  ;;  %p639_p8 = scmp.ne.s32.totalorder %s958_s20, %s638_s29  ;;  %p1023_p2 = scmp.ne.s32.totalorder %s1019_s27, 0 }
  0x71   : > { %s734_s15 = smov [#allocation8]  }
  0x72   : > { %p640_p1 = pnand %p639_p8, %p1023_p2  ;;  %s642_s28 = sshll.u32 %s734_s15, 4  ;;  %s643_s28 = int_to_ptr.vmem [resolvable:$false] %s642_s28 }
  0x73   : > { %459 = vmatmul.mubr.msk.f32.vlgmr.msra.gmra.mrb[0].mxu0 %vm240_vm1, %v237_v5  ;;  %s644_s25 = scalar_lea.vmem %s643_s28, 256  ;;  %p645_p3 = scmp.lt.s32.totalorder %s958_s20, %s643_s28 }
  0x74   : > { %p641_p10 = pneg %p640_p1  ;;  %p646_p5 = scmp.lt.s32.totalorder %s644_s25, %s638_s29 }
  0x76   : > { %p647_p9 = por %p646_p5, %p645_p3 }
  0x78   : > { %p648_p11 = pnand %p647_p9, %p641_p10 }
 0x146   : > { %v310_v7 = vpop.f32.mrb[0].mxu0 }
 0x147   : > { %v315_v8 = vadd.f32 %v314_v6, %v310_v7  ;;  %v460_v9 = vpop.f32.mrb[1].mxu0 }
 0x149   : > { %316 = vst [vmem:[%s236_s24] sm:$0xff] %v315_v8 }
 0x14a   : > { %651 = shalt.err (!%p648_p11)
}
 0x14b   : > { %s652_s4 = scalar_lea.hbm %s956_s8, 128  ;;  %s656_s9 = scalar_lea.hbm %s1008_s3, 256 }
 0x14c   : > { %p653_p0 = scmp.ne.s32.totalorder %s956_s8, %s652_s4  ;;  %p657_p6 = scmp.lt.u32.totalorder %s956_s8, %s1008_s3 }
 0x14d   : > { %p658_p7 = scmp.lt.u32.totalorder %s656_s9, %s652_s4  ;;  %p660_p8 = scmp.lt.u32.totalorder %s652_s4, %s956_s8 }
 0x14e   : > { %p654_p4 = pnand %p653_p0, %p1023_p2 }
 0x14f   : > { %p659_p12 = por %p658_p7, %p657_p6 }
 0x150   : > { %p655_p13 = pneg %p654_p4 }
 0x151   : > { %p661_p1 = por %p660_p8, %p659_p12 }
 0x153   : > { %p662_p10 = pnand %p661_p1, %p655_p13 }
 0x155   : > { %665 = shalt.err (!%p662_p10)
}
 0x156   : > { %474 = dma.vmem_to_hbm [thread:$0]  (%p1023_p2), %s958_s20, 128, %s956_s8, %s318_s26  }
 0x157 PF: > { %s344_s19 = sand.u32 1, %s704_s12   ;;  %p1024_p3 = scmp.ne.s32.totalorder %s1016_s23, 0 }
 0x158   : > { %p1025_p5 = scmp.ge.s32.totalorder %s724_s17, 2  ;;  %s345_s22 = scalar_lea.sflag [#allocation4], %s344_s19 }
 0x15a   : > { %p488_p9 = pnand %p1025_p5, %p1024_p3 }
 0x15c   : > { %699 = dma.done.wait (!%p488_p9), %s345_s22, 128  }
 0x15d   : > { %701 = vsyncadd (!%p488_p9), %s345_s22, 4294967168  ;;  %s20_s17 = sadd.s32 1, %s724_s17   ;;  %s1026_s12 = smov %s708_s13 }
 0x15e   : > { %p17_p11 = scmp.ge.s32.totalorder %s20_s17, 4   ;;  %s1027_s13 = smov %s712_s14 }
 0x15f   : > { %s1028_s14 = smov %s897_s30  ;;  %s1029_s15 = smov %s720_s16 }
 0x160   : > { %s1030_s16 = smov %s1032_s11  ;;  %19 = sbr.rel (!%p17_p11) target bundleno = 7 (0x7), region = 86 }
 0x167   :  { %350 = vsyncpa [#allocation3], 1 }
 0x168   :  { %352 = vsyncpa [#allocation3 + $0x1], 1 }
 0x169   :  { %353 = vsyncpa [#allocation6], 1 }
 0x16a   :  { %354 = vsyncpa [#allocation4], 1 }
 0x16b   :  { %356 = vsyncpa [#allocation4 + $0x1], 1 }

// kernel: tpu_custom_call.1
= control target key start
LH: loop header
LB: loop body
LE: loop exit
PB: predicated region body
PF: predicated region fallthrough
CT: control target
= control target key end

     0   :  { %8 = vsyncpa [#allocation3], 0  ;;  %s1005_s0 = inlined_call_operand.hbm [shape: f32[2,8,16], index: 0, kind: input, shape index: {}]   ;;  %s1006_s1 = inlined_call_operand.hbm [shape: f32[16,128], index: 1, kind: input, shape index: {}]   ;;  %s1007_s2 = inlined_call_operand.hbm [shape: f32[8,128], index: 2, kind: input, shape index: {}]   ;;  %s1008_s3 = inlined_call_operand.hbm [shape: f32[2,8,128], index: 3, kind: output, shape index: {}]  }
   0x1   :  { %10 = vsyncpa [#allocation3 + $0x1], 0 }
   0x2   :  { %11 = vsyncpa [#allocation6], 0 }
   0x3   :  { %12 = vsyncpa [#allocation4], 0 }
   0x4   :  { %14 = vsyncpa [#allocation4 + $0x1], 0  ;;  %s755_s12 = smov 0   ;;  %s757_s13 = smov 0  }
   0x5   :  { %s759_s14 = smov 0   ;;  %s761_s15 = smov 0  }
   0x6   :  { %s763_s16 = smov 0   ;;  %s765_s17 = smov 0  }
   0x7 LB: > { %s433_s18 = sadd.s32 4294967295, %s724_s17   ;;  %s434_s19 = sadd.s32 4294967294, %s724_s17   ;;  %s724_s17 = sphi %s765_s17, %s20_s17   ;;  %s720_s16 = sphi %s763_s16, %s1030_s16   ;;  %s716_s15 = sphi %s761_s15, %s1029_s15   ;;  %s712_s14 = sphi %s759_s14, %s1028_s14   ;;  %s708_s13 = sphi %s757_s13, %s1027_s13   ;;  %s704_s12 = sphi %s755_s12, %s1026_s12  }
   0x8   : > { %p54_p0 = scmp.ne.s32.totalorder %s708_s13, %s704_s12  ;;  %p789_p1 = scmp.eq.s32.totalorder %s433_s18, 0 }
   0x9   : > { %p793_p2 = scmp.eq.s32.totalorder %s433_s18, 1  ;;  %p133_p3 = scmp.eq.s32.totalorder %s434_s19, 1 }
   0xa   : > { %s1013_s20 = scalar_select %p789_p1, 1, 0 }
   0xb   : > { %p799_p4 = por %p789_p1, %p54_p0  ;;  %p435_p5 = scmp.ge.s32.totalorder %s724_s17, 1 }
   0xc   : > { %p804_p6 = por %p133_p3, %p54_p0  ;;  %p140_p7 = scmp.lt.s32.totalorder %s724_s17, 3 }
   0xd   : > { %s1015_s22 = scalar_select %p799_p4, 1, 0 }
   0xe   : > { %s1016_s23 = scalar_select %p804_p6, 1, 0 }
   0xf   : > { %p809_p8 = pnand %p435_p5, %p140_p7  ;;  %s726_s25 = smov [#allocation5]  }
  0x10   : > { %s152_s26 = sshll.u32 %s726_s25, 4  ;;  %s727_s28 = smov [#allocation7]   ;;  %s813_s26 = int_to_ptr.vmem [resolvable:$true] %s152_s26 }
  0x11   : > { %p476_p9 = pneg %p809_p8  ;;  %s168_s29 = sshll.u32 %s727_s28, 4  ;;  %s824_s29 = int_to_ptr.vmem [resolvable:$true] %s168_s29 }
  0x12   : > { %s552_s5 = scalar_lea.hbm %s1006_s1, 256 }
  0x13   : > { %p820_p11 = pnand %p476_p9, %p789_p1  ;;  %p553_p12 = scmp.ne.s32.totalorder %s1006_s1, %s552_s5 }
  0x14   : > { %p559_p5 = scmp.lt.u32.totalorder %s552_s5, %s1006_s1 }
  0x15   : > { %p554_p13 = pneg %p820_p11 }
  0x17   : > { %p555_p0 = pnand %p554_p13, %p553_p12 }
  0x19   : > { %p556_p3 = pneg %p555_p0 }
  0x1b   : > { %p561_p7 = pnand %p559_p5, %p556_p3 }
  0x1d   : > { %564 = shalt.err (!%p561_p7)
}
  0x1e   : > { %s565_s10 = scalar_lea.vmem %s813_s26, 256  ;;  %p573_p1 = scmp.lt.s32.totalorder %s813_s26, %s813_s26 }
  0x1f   : > { %p566_p9 = scmp.ne.s32.totalorder %s813_s26, %s565_s10  ;;  %p574_p12 = scmp.lt.s32.totalorder %s565_s10, %s565_s10 }
  0x21   : > { %p568_p10 = pnand %p566_p9, %p554_p13  ;;  %p575_p0 = por %p574_p12, %p573_p1 }
  0x23   : > { %p569_p6 = pneg %p568_p10 }
  0x25   : > { %p576_p4 = pnand %p575_p0, %p569_p6 }
  0x27   : > { %579 = shalt.err (!%p576_p4)
}
  0x28   : > { %s728_s11 = smov 128   ;;  %s729_s18 = smov 8  }
  0x29   : > { %479 = dma.hbm_to_vmem [thread:$0]  (!%p820_p11), %s1006_s1, 256, %s813_s26, [#allocation6], %s728_s11, %s728_s11, %s729_s18  }
  0x2a   : > { %s580_s4 = scalar_lea.hbm %s1007_s2, 128 }
  0x2b   : > { %p581_p1 = scmp.ne.s32.totalorder %s1007_s2, %s580_s4  ;;  %p587_p10 = scmp.lt.u32.totalorder %s580_s4, %s1007_s2 }
  0x2d   : > { %p583_p4 = pnand %p581_p1, %p554_p13 }
  0x2f   : > { %p584_p6 = pneg %p583_p4 }
  0x31   : > { %p589_p3 = pnand %p587_p10, %p584_p6 }
  0x33   : > { %592 = shalt.err (!%p589_p3)
}
  0x34   : > { %s593_s26 = scalar_lea.vmem %s824_s29, 128  ;;  %p601_p12 = scmp.lt.s32.totalorder %s824_s29, %s824_s29 }
  0x35   : > { %p594_p5 = scmp.ne.s32.totalorder %s824_s29, %s593_s26  ;;  %p602_p0 = scmp.lt.s32.totalorder %s593_s26, %s593_s26 }
  0x37   : > { %p596_p7 = pnand %p594_p5, %p554_p13  ;;  %p603_p1 = por %p602_p0, %p601_p12 }
  0x39   : > { %p597_p9 = pneg %p596_p7 }
  0x3b   : > { %p604_p4 = pnand %p603_p1, %p597_p9 }
  0x3d   : > { %607 = shalt.err (!%p604_p4)
}
  0x3e   : > { %482 = dma.hbm_to_vmem [thread:$0]  (!%p820_p11), %s1007_s2, 128, %s824_s29, [#allocation6]  }
  0x3f   : > { %s32_s11 = sadd.s32 1, %s720_s16  ;;  %s41_s18 = sadd.s32 1, %s712_s14 }
  0x40   : > { %p34_p13 = scmp.ge.s32.totalorder %s32_s11, 2  ;;  %p48_p6 = scmp.ne.s32.totalorder %s712_s14, %s708_s13 }
  0x41   : > { %p49_p10 = scmp.eq.s32.totalorder %s724_s17, 0  ;;  %p493_p3 = scmp.lt.s32.totalorder %s724_s17, 2 }
  0x42   : > { %s1032_s11 = smov (%p34_p13, %s32_s11), 0  ;;  %p888_p7 = por %p793_p2, %p48_p6 }
  0x43   : > { %p50_p5 = por %p49_p10, %p48_p6  ;;  %s36_s19 = ssub.s32 %s720_s16, %s1032_s11 }
  0x44   : > { %s1019_s27 = scalar_select %p888_p7, 1, 0 }
  0x45   : > { %s179_s25 = sand.u32 1, %s712_s14   ;;  %p39_p9 = scmp.eq.s32.totalorder %s36_s19, 0 }
  0x46   : > { %s439_s29 = sshll.u32 %s179_s25, 3  ;;  %s440_s28 = sshll.u32 %s720_s16, 7 }
  0x47   : > { %s897_s30 = scalar_select %p39_p9, %s712_s14, %s41_s18  }
  0x48   : > { %s902_s6 = scalar_lea.hbm %s1005_s0, %s440_s28  ;;  %s183_s21 = scalar_lea.vmem [#allocation2], %s439_s29 }
  0x49   : > { %s191_s7 = sshll.u32 %s183_s21, 4  ;;  %p906_p2 = pnand %p493_p3, %p50_p5  ;;  %s910_s7 = int_to_ptr.vmem [resolvable:$true] %s191_s7 }
  0x4a   : > { %s180_s26 = scalar_lea.sflag [#allocation3], %s179_s25  ;;  %s608_s9 = scalar_lea.hbm %s902_s6, 128 }
  0x4b   : > { %p609_p11 = scmp.ne.s32.totalorder %s902_s6, %s608_s9  ;;  %p610_p12 = pneg %p906_p2 }
  0x4c   : > { %s613_s19 = scalar_lea.hbm %s1005_s0, 256  ;;  %p614_p4 = scmp.lt.u32.totalorder %s902_s6, %s1005_s0 }
  0x4d   : > { %p611_p0 = pnand %p610_p12, %p609_p11  ;;  %p615_p13 = scmp.lt.u32.totalorder %s613_s19, %s608_s9 }
  0x4e   : > { %p617_p10 = scmp.lt.u32.totalorder %s608_s9, %s902_s6 }
  0x4f   : > { %p612_p1 = pneg %p611_p0  ;;  %p616_p6 = por %p615_p13, %p614_p4 }
  0x51   : > { %p618_p3 = por %p617_p10, %p616_p6 }
  0x53   : > { %p619_p5 = pnand %p618_p3, %p612_p1 }
  0x55   : > { %622 = shalt.err (!%p619_p5)
}
  0x56   : > { %s623_s25 = scalar_lea.vmem %s910_s7, 128  ;;  %s730_s4 = smov [#allocation2]  }
  0x57   : > { %p624_p9 = scmp.ne.s32.totalorder %s910_s7, %s623_s25  ;;  %s628_s5 = sshll.u32 %s730_s4, 4  ;;  %s629_s5 = int_to_ptr.vmem [resolvable:$false] %s628_s5 }
  0x58   : > { %s630_s21 = scalar_lea.vmem %s629_s5, 256  ;;  %p631_p7 = scmp.lt.s32.totalorder %s910_s7, %s629_s5 }
  0x59   : > { %p626_p11 = pnand %p624_p9, %p610_p12  ;;  %p632_p4 = scmp.lt.s32.totalorder %s630_s21, %s623_s25 }
  0x5b   : > { %p627_p0 = pneg %p626_p11  ;;  %p633_p13 = por %p632_p4, %p631_p7 }
  0x5d   : > { %p634_p6 = pnand %p633_p13, %p627_p0 }
  0x5f   : > { %637 = shalt.err (!%p634_p6)
}
  0x60   : > { %486 = dma.hbm_to_vmem [thread:$0]  (!%p906_p2), %s902_s6, 128, %s910_s7, %s180_s26  }
  0x61   : > { %200 = sbr.rel (%p809_p8) target bundleno = 343 (0x157), region = 32  ;;  %s940_s9 = sand.u32 (!%p809_p8), 1, %s708_s13  }
  0x62   : > { %s442_s10 = sshll.u32 (!%p809_p8), %s940_s9, 3  ;;  %s203_s18 = scalar_lea.sflag (!%p809_p8), [#allocation3], %s940_s9 }
  0x63   : > { %s206_s19 = scalar_lea.vmem (!%p809_p8), [#allocation2], %s442_s10  ;;  %p1021_p7 = scmp.ne.s32.totalorder (!%p809_p8), %s1015_s22, 0 }
  0x68   : > { %691 = dma.done.wait (%p1021_p7), %s203_s18, 128  }
  0x69   : > { %693 = vsyncadd (%p1021_p7), %s203_s18, 4294967168  ;;  %p1022_p12 = scmp.ne.s32.totalorder %s1013_s20, 0 }
  0x6b   : > { %695 = dma.done.wait (%p1022_p12), [#allocation6], 384  }
  0x6c   : > { %697 = vsyncadd (%p1022_p12), [#allocation6], 4294966912  ;;  %v731_v0 = vmov 0.0|0.0   ;;  %vm732_vm0 = vmmov 0   ;;  %v733_v1 = vmov 0.0   ;;  %v238_v2 = vld [vmem:[#allocation5] sm:$0xff] }
  0x6d   : > { %461 = vmatprep.subr.bf16.mxu0 %v731_v0  ;;  %458 = vmatprep.mubr.msk.f32.mxu0 %vm732_vm0, %v733_v1  ;;  %v239_v3 = vld [vmem:[#allocation5 + $0x8] sm:$0xff]  ;;  %v237_v5 = vld [vmem:[%s206_s19] sm:$0xff]  ;;  %vm240_vm1 = vcmask 130048   ;;  %s448_s22 = sshll.u32 %s716_s15, 7  ;;  %s236_s24 = scalar_lea.vmem [#allocation8], %s442_s10 }
  0x6e   : > { %v462_v4 = vpack.c.bf16 %v239_v3, %v238_v2  ;;  %v314_v6 = vld [vmem:[#allocation7] sm:$0xff]  ;;  %s332_s20 = sshll.u32 %s236_s24, 4  ;;  %s956_s8 = scalar_lea.hbm %s1008_s3, %s448_s22  ;;  %s958_s20 = int_to_ptr.vmem [resolvable:$true] %s332_s20 }
  0x6f   : > { %s318_s26 = scalar_lea.sflag [#allocation4], %s940_s9  ;;  %s638_s29 = scalar_lea.vmem %s958_s20, 128 }
  0x70   : > { %463 = vmatpush3.bf16.msra.mxu0 %v462_v4  ;;  %p639_p8 = scmp.ne.s32.totalorder %s958_s20, %s638_s29  ;;  %p1023_p2 = scmp.ne.s32.totalorder %s1019_s27, 0 }
  0x71   : > { %s734_s15 = smov [#allocation8]  }
  0x72   : > { %p640_p1 = pnand %p639_p8, %p1023_p2  ;;  %s642_s28 = sshll.u32 %s734_s15, 4  ;;  %s643_s28 = int_to_ptr.vmem [resolvable:$false] %s642_s28 }
  0x73   : > { %459 = vmatmul.mubr.msk.f32.vlgmr.msra.gmra.mrb[0].mxu0 %vm240_vm1, %v237_v5  ;;  %s644_s25 = scalar_lea.vmem %s643_s28, 256  ;;  %p645_p3 = scmp.lt.s32.totalorder %s958_s20, %s643_s28 }
  0x74   : > { %p641_p10 = pneg %p640_p1  ;;  %p646_p5 = scmp.lt.s32.totalorder %s644_s25, %s638_s29 }
  0x76   : > { %p647_p9 = por %p646_p5, %p645_p3 }
  0x78   : > { %p648_p11 = pnand %p647_p9, %p641_p10 }
 0x146   : > { %v310_v7 = vpop.f32.mrb[0].mxu0 }
 0x147   : > { %v315_v8 = vadd.f32 %v314_v6, %v310_v7  ;;  %v460_v9 = vpop.f32.mrb[1].mxu0 }
 0x149   : > { %316 = vst [vmem:[%s236_s24] sm:$0xff] %v315_v8 }
 0x14a   : > { %651 = shalt.err (!%p648_p11)
}
 0x14b   : > { %s652_s4 = scalar_lea.hbm %s956_s8, 128  ;;  %s656_s9 = scalar_lea.hbm %s1008_s3, 256 }
 0x14c   : > { %p653_p0 = scmp.ne.s32.totalorder %s956_s8, %s652_s4  ;;  %p657_p6 = scmp.lt.u32.totalorder %s956_s8, %s1008_s3 }
 0x14d   : > { %p658_p7 = scmp.lt.u32.totalorder %s656_s9, %s652_s4  ;;  %p660_p8 = scmp.lt.u32.totalorder %s652_s4, %s956_s8 }
 0x14e   : > { %p654_p4 = pnand %p653_p0, %p1023_p2 }
 0x14f   : > { %p659_p12 = por %p658_p7, %p657_p6 }
 0x150   : > { %p655_p13 = pneg %p654_p4 }
 0x151   : > { %p661_p1 = por %p660_p8, %p659_p12 }
 0x153   : > { %p662_p10 = pnand %p661_p1, %p655_p13 }
 0x155   : > { %665 = shalt.err (!%p662_p10)
}
 0x156   : > { %474 = dma.vmem_to_hbm [thread:$0]  (%p1023_p2), %s958_s20, 128, %s956_s8, %s318_s26  }
 0x157 PF: > { %s344_s19 = sand.u32 1, %s704_s12   ;;  %p1024_p3 = scmp.ne.s32.totalorder %s1016_s23, 0 }
 0x158   : > { %p1025_p5 = scmp.ge.s32.totalorder %s724_s17, 2  ;;  %s345_s22 = scalar_lea.sflag [#allocation4], %s344_s19 }
 0x15a   : > { %p488_p9 = pnand %p1025_p5, %p1024_p3 }
 0x15c   : > { %699 = dma.done.wait (!%p488_p9), %s345_s22, 128  }
 0x15d   : > { %701 = vsyncadd (!%p488_p9), %s345_s22, 4294967168  ;;  %s20_s17 = sadd.s32 1, %s724_s17   ;;  %s1026_s12 = smov %s708_s13 }
 0x15e   : > { %p17_p11 = scmp.ge.s32.totalorder %s20_s17, 4   ;;  %s1027_s13 = smov %s712_s14 }
 0x15f   : > { %s1028_s14 = smov %s897_s30  ;;  %s1029_s15 = smov %s720_s16 }
 0x160   : > { %s1030_s16 = smov %s1032_s11  ;;  %19 = sbr.rel (!%p17_p11) target bundleno = 7 (0x7), region = 86 }
 0x167   :  { %350 = vsyncpa [#allocation3], 1 }
 0x168   :  { %352 = vsyncpa [#allocation3 + $0x1], 1 }
 0x169   :  { %353 = vsyncpa [#allocation6], 1 }
 0x16a   :  { %354 = vsyncpa [#allocation4], 1 }
 0x16b   :  { %356 = vsyncpa [#allocation4 + $0x1], 1 }

</bundles_post_ra>
